<compile_context>
chip_gen: v7x
topology: tpu7x:2x2x1
jax: 0.10.0
libtpu: 0.0.40
codegen_flags: <defaults>
</compile_context>

<pallas_src>
import math
import functools

import jax
import jax.numpy as jnp
from jax.experimental import pallas as pl
from jax.experimental.pallas import tpu as pltpu

_INV_SQRT2 = 1.0 / math.sqrt(2.0)


def _round_up(x, m):
    return (x + m - 1) // m * m


def _vmem_capacity_bytes():
    """Physical per-core VMEM (128 MiB on v5e/v6e, 64 MiB per TC on v7x)."""
    try:
        cap = getattr(pltpu.get_tpu_info(), "vmem_capacity_bytes", None)
        if cap:
            return int(cap)
    except Exception:
        pass
    return 64 << 20  # conservative fallback: assume the smallest (v7x) VMEM


# ----------------------------- kernels -----------------------------

def _gelu_exact(h):
    # Exact erf-form GELU, matching torch.nn.GELU() default numerics.
    return 0.5 * h * (1.0 + jax.lax.erf(h * _INV_SQRT2))


def _ffn_kernel_resident(x_ref, w1_ref, b1_ref, w2_ref, b2_ref, o_ref):
    """Single hidden step: both weight matrices fully resident in VMEM, no scratch."""
    h = jnp.dot(x_ref[...], w1_ref[...], preferred_element_type=jnp.float32)
    h = _gelu_exact(h + b1_ref[...].astype(jnp.float32))
    # Dropout(p=0.0) is identity in both train and eval; nothing to do.
    out = jnp.dot(h.astype(w2_ref.dtype), w2_ref[...],
                  preferred_element_type=jnp.float32)
    o_ref[...] = (out + b2_ref[...].astype(jnp.float32)).astype(o_ref.dtype)


def _ffn_kernel_stream(x_ref, w1_ref, b1_ref, w2_ref, b2_ref, o_ref, acc_ref):
    """Hidden dimension streamed in slabs; f32 accumulator kept in VMEM scratch."""
    h_idx = pl.program_id(1)

    @pl.when(h_idx == 0)
    def _():
        acc_ref[...] = jnp.zeros_like(acc_ref)

    h = jnp.dot(x_ref[...], w1_ref[...], preferred_element_type=jnp.float32)
    h = _gelu_exact(h + b1_ref[...].astype(jnp.float32))
    # Dropout(p=0.0) is identity; second matmul feeds the MXU in the weight dtype.
    acc_ref[...] += jnp.dot(h.astype(w2_ref.dtype), w2_ref[...],
                            preferred_element_type=jnp.float32)

    @pl.when(h_idx == pl.num_programs(1) - 1)
    def _():
        o_ref[...] = (acc_ref[...] + b2_ref[...].astype(jnp.float32)
                      ).astype(o_ref.dtype)


# ------------------------- tile selection --------------------------

def _block_vmem_bytes(tm, dim, th, bpe_x, bpe_w, streaming):
    """Conservative VMEM estimate: double-buffered blocks + in-kernel temporaries."""
    return (
        2 * tm * dim * bpe_x          # x row tile (double-buffered)
        + 2 * dim * th * bpe_w        # W1 slab
        + 2 * th * bpe_w              # b1 slab
        + 2 * th * dim * bpe_w        # W2 slab
        + 2 * dim * bpe_w             # b2
        + 2 * tm * dim * bpe_x        # out tile
        + tm * th * (4 + bpe_w)       # (tm, th) f32 GELU intermediate + cast copy
        + tm * dim * (4 + bpe_x)      # (tm, dim) f32 second-matmul result + downcast
        + (tm * dim * 4 if streaming else 0)   # f32 accumulator scratch
    )


def _choose_tiles(n_rows, dim, hidden, x_dtype, w_dtype, vmem_cap):
    bpe_x = jnp.dtype(x_dtype).itemsize
    bpe_w = jnp.dtype(w_dtype).itemsize
    budget = max(vmem_cap - (4 << 20), 8 << 20)

    rows_cap = _round_up(n_rows, 8)
    # Weight-streaming compute/DMA crossover is ~600 rows on v6e/v7x bf16 (~240 on v5e);
    # larger tm also amortizes the ~0.35us grid-step overhead.
    tm_target = 1024 if vmem_cap > (96 << 20) else 512
    tm_cands = [c for c in (1024, 768, 512, 384, 256, 128, 64, 32, 16, 8)
                if c <= min(tm_target, rows_cap)]
    if not tm_cands:
        tm_cands = [rows_cap]

    # 1) Keep both weight matrices resident whenever they fit: weights are then DMAed
    #    from HBM exactly once, independent of the number of row tiles.
    for tm in tm_cands:
        if _block_vmem_bytes(tm, dim, hidden, bpe_x, bpe_w, False) <= budget:
            if _round_up(n_rows, tm) // tm == 1 and tm >= 16:
                # Give v7x megacore a second row tile to shard; costless on single-core
                # chips since the (resident) weight block index is constant.
                tm = _round_up(max(tm // 2, 8), 8)
            return tm, hidden

    # 2) Stream the hidden dimension in slabs. th must divide hidden (no weight padding
    #    inside the jitted wrapper) and be a multiple of 128; larger tm is preferred first
    #    (weight HBM traffic ~ rows/tm), shrinking th before shrinking tm.
    if hidden % 128 == 0:
        th_cands = [t for t in (4096, 2048, 1024, 512, 256, 128)
                    if t < hidden and hidden % t == 0]
        for tm in tm_cands:
            for th in th_cands:
                if _block_vmem_bytes(tm, dim, th, bpe_x, bpe_w, True) <= budget:
                    return tm, th

    # 3) Fallback: smallest row tile with fully-resident weights (vmem_limit is capped
    #    at physical capacity below).
    # TODO(synk): for hidden dims that are not multiples of 128 and too large for VMEM,
    # pad the weights once outside jit instead of streaming slabs.
    return tm_cands[-1], hidden


# ----------------------------- wrapper ------------------------------

@functools.partial(jax.jit, static_argnames=("tm", "th", "vmem_limit"))
def _feed_forward_impl(x, w1, b1, w2, b2, *, tm, th, vmem_limit):
    B, S, dim = x.shape
    hidden = w1.shape[1]
    n_rows = B * S

    rows_p = _round_up(n_rows, tm)
    x2d = x.reshape(n_rows, dim)
    if rows_p != n_rows:
        x2d = jnp.pad(x2d, ((0, rows_p - n_rows), (0, 0)))  # pad rows only (cheap, exact)

    b1_2d = b1.reshape(1, hidden)
    b2_2d = b2.reshape(1, dim)

    n_hidden_steps = hidden // th
    streaming = n_hidden_steps > 1
    grid = (rows_p // tm, n_hidden_steps)

    bpe_x = x.dtype.itemsize
    bpe_w = w1.dtype.itemsize
    weight_bytes = (2 * dim * hidden + hidden + dim) * bpe_w
    n_weight_passes = (rows_p // tm) if streaming else 1
    cost = pl.CostEstimate(
        flops=4 * rows_p * dim * hidden,                 # two matmuls, 2*M*N*K each
        transcendentals=rows_p * hidden,                 # erf per hidden activation
        bytes_accessed=2 * rows_p * dim * bpe_x + n_weight_passes * weight_bytes,
    )

    in_specs = [
        pl.BlockSpec((tm, dim), lambda i, h: (i, 0)),    # x row tile
        pl.BlockSpec((dim, th), lambda i, h: (0, h)),    # W1 hidden slab
        pl.BlockSpec((1, th), lambda i, h: (0, h)),      # b1 hidden slab
        pl.BlockSpec((th, dim), lambda i, h: (h, 0)),    # W2 hidden slab
        pl.BlockSpec((1, dim), lambda i, h: (0, 0)),     # b2
    ]
    out_spec = pl.BlockSpec((tm, dim), lambda i, h: (i, 0))

    kernel = _ffn_kernel_stream if streaming else _ffn_kernel_resident
    scratch = [pltpu.VMEM((tm, dim), jnp.float32)] if streaming else []

    out = pl.pallas_call(
        kernel,
        out_shape=jax.ShapeDtypeStruct((rows_p, dim), x.dtype),
        grid_spec=pltpu.PrefetchScalarGridSpec(
            num_scalar_prefetch=0,
            grid=grid,
            in_specs=in_specs,
            out_specs=out_spec,
            scratch_shapes=scratch,
        ),
        compiler_params=pltpu.CompilerParams(
            dimension_semantics=("parallel", "arbitrary"),
            vmem_limit_bytes=vmem_limit,
        ),
        cost_estimate=cost,
    )(x2d, w1, b1_2d, w2, b2_2d)

    return out[:n_rows].reshape(B, S, dim)


def feed_forward(x, w1, b1, w2, b2):
    """x: [B, S, dim] -> [B, S, dim].  w1: [dim, hidden], b1: [hidden], w2: [hidden, dim], b2: [dim]."""
    B, S, dim = x.shape
    hidden = w1.shape[1]
    n_rows = B * S

    vmem_cap = _vmem_capacity_bytes()
    tm, th = _choose_tiles(n_rows, dim, hidden, x.dtype, w1.dtype, vmem_cap)
    streaming = th < hidden

    bpe_x = jnp.dtype(x.dtype).itemsize
    bpe_w = jnp.dtype(w1.dtype).itemsize
    need = _block_vmem_bytes(tm, dim, th, bpe_x, bpe_w, streaming)
    vmem_limit = int(min(need + (4 << 20), vmem_cap - (2 << 20)))
    vmem_limit = max(vmem_limit, 8 << 20)

    return _feed_forward_impl(x, w1, b1, w2, b2, tm=tm, th=th, vmem_limit=vmem_limit)


def init_params(key, dim, hidden_dim, dtype=jnp.float32):
    """Deterministic init mimicking nn.Linear defaults (uniform +- 1/sqrt(fan_in))."""
    k1, k2, k3, k4 = jax.random.split(key, 4)
    bound1 = 1.0 / math.sqrt(dim)
    bound2 = 1.0 / math.sqrt(hidden_dim)
    w1 = jax.random.uniform(k1, (dim, hidden_dim), dtype, -bound1, bound1)
    b1 = jax.random.uniform(k2, (hidden_dim,), dtype, -bound1, bound1)
    w2 = jax.random.uniform(k3, (hidden_dim, dim), dtype, -bound2, bound2)
    b2 = jax.random.uniform(k4, (dim,), dtype, -bound2, bound2)
    return w1, b1, w2, b2


if __name__ == "__main__":
    key = jax.random.PRNGKey(0)
    kx, kp = jax.random.split(key)

    B, S, dim, hidden_dim = 2, 8, 32, 64
    x = jax.random.normal(kx, (B, S, dim), dtype=jnp.float32)
    w1, b1, w2, b2 = init_params(kp, dim, hidden_dim)

    out = feed_forward(x, w1, b1, w2, b2)
    out = jax.block_until_ready(out)

    # Reference check in plain JAX (exact erf GELU, dropout(p=0) is identity).
    h_ref = x @ w1 + b1
    h_ref = 0.5 * h_ref * (1.0 + jax.lax.erf(h_ref / math.sqrt(2.0)))
    ref = h_ref @ w2 + b2
    assert out.shape == (B, S, dim)
    assert jnp.allclose(out, ref, atol=1e-4, rtol=1e-4), "mismatch vs reference"

    print("KERNEL_OK")
</pallas_src>

<mosaic_0001>
module attributes {stable_mosaic.version = 11 : i64} {
  func.func @_ffn_kernel_resident(%arg0: i32, %arg1: i32, %arg2: memref<8x32xf32, #tpu.memory_space<vmem>>, %arg3: memref<32x64xf32, #tpu.memory_space<vmem>>, %arg4: memref<1x64xf32, #tpu.memory_space<vmem>>, %arg5: memref<64x32xf32, #tpu.memory_space<vmem>>, %arg6: memref<1x32xf32, #tpu.memory_space<vmem>>, %arg7: memref<8x32xf32, #tpu.memory_space<vmem>>) attributes {dimension_semantics = [#tpu.dimension_semantics<parallel>, #tpu.dimension_semantics<arbitrary>], iteration_bounds = array<i64: 2, 1>, scalar_prefetch = 0 : i64, scratch_operands = 0 : i64, tpu.core_type = #tpu.core_type<tc>, window_params = [{transform_indices = @transform_0, window_bounds = array<i64: 8, 32>}, {transform_indices = @transform_1, window_bounds = array<i64: 32, 64>}, {transform_indices = @transform_2, window_bounds = array<i64: 1, 64>}, {transform_indices = @transform_3, window_bounds = array<i64: 64, 32>}, {pipeline_mode = #tpu.pipeline_mode<synchronous>, transform_indices = @transform_4, window_bounds = array<i64: 1, 32>}, {transform_indices = @transform_5, window_bounds = array<i64: 8, 32>}]} {
    %c0 = arith.constant 0 : index
    %c0_0 = arith.constant 0 : index
    %0 = vector.load %arg2[%c0, %c0_0] : memref<8x32xf32, #tpu.memory_space<vmem>>, vector<8x32xf32>
    %c0_1 = arith.constant 0 : index
    %c0_2 = arith.constant 0 : index
    %1 = vector.load %arg3[%c0_1, %c0_2] : memref<32x64xf32, #tpu.memory_space<vmem>>, vector<32x64xf32>
    %cst = arith.constant dense<0.000000e+00> : vector<8x64xf32>
    %2 = tpu.matmul %0, %1, %cst {dimension_numbers = #tpu.dot_dimension_numbers<[1], [0], [0], [1], [0, 0, 1, 1], [], []>} : vector<8x32xf32>, vector<32x64xf32>, vector<8x64xf32> -> vector<8x64xf32>
    %c0_3 = arith.constant 0 : index
    %c0_4 = arith.constant 0 : index
    %3 = vector.load %arg4[%c0_3, %c0_4] : memref<1x64xf32, #tpu.memory_space<vmem>>, vector<1x64xf32>
    %4 = vector.broadcast %3 : vector<1x64xf32> to vector<8x64xf32>
    %5 = arith.addf %2, %4 : vector<8x64xf32>
    %cst_5 = arith.constant 5.000000e-01 : f32
    %6 = vector.broadcast %cst_5 : f32 to vector<8x64xf32>
    %7 = arith.mulf %6, %5 : vector<8x64xf32>
    %cst_6 = arith.constant 0.707106769 : f32
    %8 = vector.broadcast %cst_6 : f32 to vector<8x64xf32>
    %9 = arith.mulf %5, %8 : vector<8x64xf32>
    %10 = math.erf %9 : vector<8x64xf32>
    %cst_7 = arith.constant 1.000000e+00 : f32
    %11 = vector.broadcast %cst_7 : f32 to vector<8x64xf32>
    %12 = arith.addf %11, %10 : vector<8x64xf32>
    %13 = arith.mulf %7, %12 : vector<8x64xf32>
    %c0_8 = arith.constant 0 : index
    %c0_9 = arith.constant 0 : index
    %14 = vector.load %arg5[%c0_8, %c0_9] : memref<64x32xf32, #tpu.memory_space<vmem>>, vector<64x32xf32>
    %cst_10 = arith.constant dense<0.000000e+00> : vector<8x32xf32>
    %15 = tpu.matmul %13, %14, %cst_10 {dimension_numbers = #tpu.dot_dimension_numbers<[1], [0], [0], [1], [0, 0, 1, 1], [], []>} : vector<8x64xf32>, vector<64x32xf32>, vector<8x32xf32> -> vector<8x32xf32>
    %c0_11 = arith.constant 0 : index
    %c0_12 = arith.constant 0 : index
    %16 = vector.load %arg6[%c0_11, %c0_12] : memref<1x32xf32, #tpu.memory_space<vmem>>, vector<1x32xf32>
    %17 = vector.broadcast %16 : vector<1x32xf32> to vector<8x32xf32>
    %18 = arith.addf %15, %17 : vector<8x32xf32>
    %c0_13 = arith.constant 0 : index
    %c0_14 = arith.constant 0 : index
    %19 = vector.load %arg7[%c0_13, %c0_14] : memref<8x32xf32, #tpu.memory_space<vmem>>, vector<8x32xf32>
    tpu.vector_store %arg7[%c0_13, %c0_14], %18 {strides = array<i32>} : memref<8x32xf32, #tpu.memory_space<vmem>>, vector<8x32xf32>,
    return
  }
  func.func @transform_0(%arg0: i32, %arg1: i32) -> (i32, i32) {
    %c0_i32 = arith.constant 0 : i32
    %c0_i32_0 = arith.constant 0 : i32
    return %arg0, %c0_i32 : i32, i32
  }
  func.func @transform_1(%arg0: i32, %arg1: i32) -> (i32, i32) {
    %c0_i32 = arith.constant 0 : i32
    %c0_i32_0 = arith.constant 0 : i32
    return %c0_i32, %arg1 : i32, i32
  }
  func.func @transform_2(%arg0: i32, %arg1: i32) -> (i32, i32) {
    %c0_i32 = arith.constant 0 : i32
    %c0_i32_0 = arith.constant 0 : i32
    return %c0_i32, %arg1 : i32, i32
  }
  func.func @transform_3(%arg0: i32, %arg1: i32) -> (i32, i32) {
    %c0_i32 = arith.constant 0 : i32
    %c0_i32_0 = arith.constant 0 : i32
    return %arg1, %c0_i32 : i32, i32
  }
  func.func @transform_4(%arg0: i32, %arg1: i32) -> (i32, i32) {
    %c0_i32 = arith.constant 0 : i32
    %c0_i32_0 = arith.constant 0 : i32
    %c0_i32_1 = arith.constant 0 : i32
    return %c0_i32, %c0_i32_0 : i32, i32
  }
  func.func @transform_5(%arg0: i32, %arg1: i32) -> (i32, i32) {
    %c0_i32 = arith.constant 0 : i32
    %c0_i32_0 = arith.constant 0 : i32
    return %arg0, %c0_i32 : i32, i32
  }
}

</mosaic_0001>

<bundles_post_ra>
// kernel: _feed_forward_impl.1
= control target key start
LH: loop header
LB: loop body
LE: loop exit
PB: predicated region body
PF: predicated region fallthrough
CT: control target
= control target key end

     0   :  { %10 = vsyncpa [#allocation3], 0  ;;  %s999_s0 = inlined_call_operand.vmem [shape: f32[16,32], index: 0, kind: input, shape index: {}]   ;;  %s1000_s1 = inlined_call_operand.vmem [shape: f32[32,64], index: 1, kind: input, shape index: {}]   ;;  %s1001_s2 = inlined_call_operand.vmem [shape: f32[1,64], index: 2, kind: input, shape index: {}]   ;;  %s1002_s3 = inlined_call_operand.vmem [shape: f32[64,32], index: 3, kind: input, shape index: {}]   ;;  %s1003_s4 = inlined_call_operand.vmem [shape: f32[1,32], index: 4, kind: input, shape index: {}]   ;;  %s1004_s5 = inlined_call_operand.hbm [shape: f32[16,32], index: 5, kind: output, shape index: {}]  }
   0x1   :  { %12 = vsyncpa [#allocation3 + $0x1], 0  ;;  %s843_s18 = smov 0   ;;  %s845_s19 = smov 0  }
   0x2   :  { %s847_s20 = smov 0   ;;  %s849_s21 = smov 0  }
   0x3   :  { %s851_s22 = smov 0   ;;  %s853_s23 = smov 0  }
   0x4 LB: > { %s589_s24 = sadd.s32 4294967295, %s807_s23   ;;  %s590_s25 = sadd.s32 4294967294, %s807_s23   ;;  %s807_s23 = sphi %s853_s23, %s18_s23   ;;  %s803_s22 = sphi %s851_s22, %s1011_s22   ;;  %s799_s21 = sphi %s849_s21, %s1010_s21   ;;  %s795_s20 = sphi %s847_s20, %s1009_s20   ;;  %s791_s19 = sphi %s845_s19, %s1008_s19   ;;  %s787_s18 = sphi %s843_s18, %s1007_s18  }
   0x5   : > { %s30_s26 = sadd.s32 1, %s803_s22  ;;  %s162_s27 = sadd.s32 1, %s795_s20 }
   0x6   : > { %p32_p0 = scmp.ge.s32.totalorder %s30_s26, 2  ;;  %p172_p1 = scmp.ne.s32.totalorder %s795_s20, %s791_s19 }
   0x7   : > { %p173_p2 = scmp.eq.s32.totalorder %s589_s24, 1  ;;  %p178_p3 = scmp.ne.s32.totalorder %s791_s19, %s787_s18 }
   0x8   : > { %s1013_s26 = smov (%p32_p0, %s30_s26), 0  ;;  %p179_p5 = scmp.eq.s32.totalorder %s590_s25, 1 }
   0x9   : > { %p883_p4 = por %p173_p2, %p172_p1  ;;  %s159_s29 = ssub.s32 %s803_s22, %s1013_s26 }
   0xa   : > { %p596_p6 = scmp.ge.s32.totalorder %s807_s23, 1  ;;  %p160_p7 = scmp.eq.s32.totalorder %s159_s29, 0 }
   0xb   : > { %p890_p8 = por %p179_p5, %p178_p3  ;;  %p229_p9 = scmp.lt.s32.totalorder %s807_s23, 3 }
   0xc   : > { %s896_s6 = scalar_select %p160_p7, %s795_s20, %s162_s27  }
   0xd   : > { %p230_p10 = pnand %p596_p6, %p229_p9 }
   0xe   : > { %v286_v0 = vld [vmem:[%s1000_s1] sm:$0xff] (!%p230_p10)  ;;  %v287_v1 = vld [vmem:[%s1000_s1 + $0x8] sm:$0xff] (!%p230_p10)  ;;  %v288_v2 = vld [vmem:[%s1000_s1 + $0x10] sm:$0xff] (!%p230_p10)  ;;  %v809_v3 = vmov (!%p230_p10), 0.0|0.0   ;;  %vm810_vm0 = vmmov (!%p230_p10), 0   ;;  %v811_v6 = vmov (!%p230_p10), 0.0  }
   0xf   : > { %233 = sbr.rel (%p230_p10) target bundleno = 486 (0x1e6), region = 40  ;;  %651 = vmatprep.subr.bf16.mxu0 (!%p230_p10), %v809_v3  ;;  %v652_v4 = vpack.c.bf16 (!%p230_p10), %v287_v1, %v286_v0  ;;  %v289_v5 = vld [vmem:[%s1000_s1 + $0x18] sm:$0xff] (!%p230_p10)  ;;  %629 = vmatprep.mubr.msk.f32.mxu0 (!%p230_p10), %vm810_vm0, %v811_v6  ;;  %p268_p11 = scmp.lt.s32.totalorder (!%p230_p10), %s799_s21, 1  ;;  %vm297_vm1 = vcmask (!%p230_p10), 261120   ;;  %v376_v9 = vld [vmem:[%s1002_s3] sm:$0xff] (!%p230_p10)  ;;  %v377_v10 = vld [vmem:[%s1002_s3 + $0x8] sm:$0xff] (!%p230_p10) }
  0x10   : > { %657 = vmatprep.subr.bf16.mxu1 (!%p230_p10), %v809_v3  ;;  %648 = vmatprep.mubr.msk.f32.mxu1 (!%p230_p10), %vm810_vm0, %v811_v6  ;;  %v655_v7 = vpack.c.bf16 (!%p230_p10), %v289_v5, %v288_v2  ;;  %v658_v11 = vpack.c.bf16 (!%p230_p10), %v377_v10, %v376_v9  ;;  %v378_v12 = vld [vmem:[%s1002_s3 + $0x10] sm:$0xff] (!%p230_p10)  ;;  %v379_v13 = vld [vmem:[%s1002_s3 + $0x18] sm:$0xff] (!%p230_p10)  ;;  %v380_v15 = vld [vmem:[%s1002_s3 + $0x20] sm:$0xff] (!%p230_p10)  ;;  %vm391_vm2 = vcmask (!%p230_p10), 523264   ;;  %s265_s8 = sand.u32 (!%p230_p10), 1, %s791_s19   ;;  %s604_s12 = sshll.u32 (!%p230_p10), %s799_s21, 7 }
  0x11   : > { %653 = vmatpush3.bf16.msra.mxu0 (!%p230_p10), %v652_v4  ;;  %v661_v14 = vpack.c.bf16 (!%p230_p10), %v379_v13, %v378_v12  ;;  %v381_v16 = vld [vmem:[%s1002_s3 + $0x28] sm:$0xff] (!%p230_p10)  ;;  %v382_v18 = vld [vmem:[%s1002_s3 + $0x30] sm:$0xff] (!%p230_p10)  ;;  %v383_v19 = vld [vmem:[%s1002_s3 + $0x38] sm:$0xff] (!%p230_p10)  ;;  %s597_s9 = sshll.u32 (!%p230_p10), %s265_s8, 3  ;;  %s951_s17 = scalar_lea.hbm (!%p230_p10), %s1004_s5, %s604_s12 }
  0x12   : > { %654 = vmatprep.subr.bf16.mxu0 (!%p230_p10), %v809_v3  ;;  %659 = vmatpush3.bf16.msra.mxu1 (!%p230_p10), %v658_v11  ;;  %v664_v17 = vpack.c.bf16 (!%p230_p10), %v381_v16, %v380_v15  ;;  %v667_v20 = vpack.c.bf16 (!%p230_p10), %v383_v19, %v382_v18  ;;  %v599_v21 = vld [vmem:[%s1001_s2] ss:$0 sm:$0xff] (!%p230_p10)  ;;  %s267_s13 = scalar_lea.vmem (!%p230_p10), [#allocation2], %s597_s9  ;;  %s467_s24 = scalar_lea.sflag (!%p230_p10), [#allocation3], %s265_s8 }
  0x13   : > { %660 = vmatprep.subr.bf16.mxu1 (!%p230_p10), %v809_v3  ;;  %v601_v30 = vld [vmem:[%s1003_s4] ss:$0 sm:$0xff] (!%p230_p10)  ;;  %s480_s14 = sshll.u32 (!%p230_p10), %s267_s13, 4  ;;  %s953_s14 = int_to_ptr.vmem [resolvable:$true] %s480_s14 }
  0x15   : > { %656 = vmatpush3.bf16.msra.mxu0 (!%p230_p10), %v655_v7 }
  0x16   : > { %s269_s15 = scalar_select %p268_p11, %s799_s21, 1  ;;  %662 = vmatpush3.bf16.msra.mxu1 %v661_v14 }
  0x17   : > { %663 = vmatprep.subr.bf16.mxu1 %v809_v3  ;;  %s812_s21 = smov [#allocation2]  }
  0x18   : > { %s598_s16 = sshll.u32 %s269_s15, 3  ;;  %s733_s27 = sshll.u32 %s812_s21, 4  ;;  %s734_s27 = int_to_ptr.vmem [resolvable:$false] %s733_s27 }
  0x19   : > { %s271_s25 = scalar_lea.vmem %s999_s0, %s598_s16  ;;  %s735_s29 = scalar_lea.vmem %s734_s27, 256 }
  0x1a   : > { %v285_v8 = vld [vmem:[%s271_s25] sm:$0xff]  ;;  %665 = vmatpush3.bf16.msra.mxu1 %v664_v17  ;;  %s729_s25 = scalar_lea.vmem %s953_s14, 128  ;;  %p736_p1 = scmp.lt.s32.totalorder %s953_s14, %s734_s27 }
  0x1b   : > { %630 = vmatmul.mubr.msk.f32.vlgmr.msra.gmra.mrb[0].mxu0 %vm297_vm1, %v285_v8  ;;  %666 = vmatprep.subr.bf16.mxu1 %v809_v3  ;;  %p730_p12 = scmp.ne.s32.totalorder %s953_s14, %s729_s25  ;;  %p737_p2 = scmp.lt.s32.totalorder %s735_s29, %s729_s25 }
  0x1d   : > { %p731_p13 = pnand %p730_p12, %p883_p4  ;;  %p738_p3 = por %p737_p2, %p736_p1 }
  0x1e   : > { %668 = vmatpush3.bf16.msra.mxu1 %v667_v20 }
  0x1f   : > { %p732_p0 = pneg %p731_p13 }
  0x21   : > { %p739_p5 = pnand %p738_p3, %p732_p0 }
  0xee   : > { %v367_v22 = vpop.f32.mrb[0].mxu0 }
  0xef   : > { %v368_v23 = vadd.f32 %v599_v21, %v367_v22  ;;  %v631_v24 = vpop.f32.mrb[1].mxu0 }
  0xf1   : > { %v372_v25 = vmul.f32 0.70710677, %v368_v23  ;;  %v371_v27 = vmul.f32 0.5, %v368_v23 }
  0xf3   : > { %727 = verf.f32 %v372_v25 }
  0xfd   : > { %v728_v26 = vpop.eup %727 }
  0xfe   : > { %v374_v28 = vadd.f32 1.0, %v728_v26 }
 0x100   : > { %v375_v29 = vmul.f32 %v374_v28, %v371_v27 }
 0x102   : > { %649 = vmatmul.mubr.msk.f32.vlgmr.msra.gmra.mrb[0].mxu1 %vm391_vm2, %v375_v29 }
 0x1d5   : > { %v461_v31 = vpop.f32.mrb[0].mxu1 }
 0x1d6   : > { %v462_v32 = vadd.f32 %v601_v30, %v461_v31  ;;  %v650_v33 = vpop.f32.mrb[1].mxu1 }
 0x1d8   : > { %465 = vst.msk [vmem:[%s267_s13] sm:$0xff] %vm297_vm1, %v462_v32 }
 0x1d9   : > { %742 = shalt.err (!%p739_p5)
}
 0x1da   : > { %s743_s7 = scalar_lea.hbm %s951_s17, 128  ;;  %s747_s10 = scalar_lea.hbm %s1004_s5, 256 }
 0x1db   : > { %p744_p6 = scmp.ne.s32.totalorder %s951_s17, %s743_s7  ;;  %p748_p10 = scmp.lt.u32.totalorder %s951_s17, %s1004_s5 }
 0x1dc   : > { %p749_p11 = scmp.lt.u32.totalorder %s747_s10, %s743_s7  ;;  %p751_p13 = scmp.lt.u32.totalorder %s743_s7, %s951_s17 }
 0x1dd   : > { %p745_p7 = pnand %p744_p6, %p883_p4 }
 0x1de   : > { %p750_p12 = por %p749_p11, %p748_p10 }
 0x1df   : > { %p746_p9 = pneg %p745_p7 }
 0x1e0   : > { %p752_p0 = por %p751_p13, %p750_p12 }
 0x1e2   : > { %p753_p1 = pnand %p752_p0, %p746_p9 }
 0x1e4   : > { %756 = shalt.err (!%p753_p1)
}
 0x1e5   : > { %669 = dma.vmem_to_hbm [thread:$0]  (%p883_p4), %s953_s14, 128, %s951_s17, %s467_s24  }
 0x1e6 PF: > { %p675_p2 = scmp.ge.s32.totalorder %s807_s23, 2  ;;  %s492_s13 = sand.u32 1, %s787_s18  }
 0x1e7   : > { %s493_s15 = scalar_lea.sflag [#allocation3], %s492_s13 }
 0x1e8   : > { %p672_p3 = pnand %p675_p2, %p890_p8 }
 0x1ea   : > { %782 = dma.done.wait (!%p672_p3), %s493_s15, 128  }
 0x1eb   : > { %784 = vsyncadd (!%p672_p3), %s493_s15, 4294967168  ;;  %s18_s23 = sadd.s32 1, %s807_s23   ;;  %s1007_s18 = smov %s791_s19 }
 0x1ec   : > { %p15_p5 = scmp.ge.s32.totalorder %s18_s23, 4   ;;  %s1008_s19 = smov %s795_s20 }
 0x1ed   : > { %s1009_s20 = smov %s896_s6  ;;  %s1010_s21 = smov %s803_s22 }
 0x1ee   : > { %s1011_s22 = smov %s1013_s26  ;;  %17 = sbr.rel (!%p15_p5) target bundleno = 4 (0x4), region = 84 }
 0x1f5   :  { %498 = vsyncpa [#allocation3], 1 }
 0x1f6   :  { %500 = vsyncpa [#allocation3 + $0x1], 1 }

</bundles_post_ra>
